<compile_context>
chip_gen: v7x
topology: tpu7x:2x2x1
jax: 0.10.0
libtpu: 0.0.40
codegen_flags: <defaults>
</compile_context>

<pallas_src>
import jax
import jax.numpy as jnp
from jax.experimental import pallas as pl
from jax.experimental.pallas import tpu as pltpu


def _round_up(x, m):
    return ((x + m - 1) // m) * m


def _critic_head_kernel(x_ref, wT_ref, b_ref, out_ref):
    # One batch tile: (TB, in) @ (in, out) + (1, out) -> (TB, out)
    q = jnp.dot(x_ref[...], wT_ref[...], preferred_element_type=jnp.float32)
    out_ref[...] = (q + b_ref[...]).astype(out_ref.dtype)


def critic_head_forward(x, wT, b2, *, block_rows=1024):
    """CriticHead.forward: x @ W^T + b.

    Parameters are expected pre-prepared (hoisted out of the hot path):
      wT : (input_size, output_size)  -- weight already transposed
      b2 : (1, output_size)           -- bias as a broadcastable row
    """
    B, in_dim = x.shape
    out_dim = wT.shape[1]

    # Batch tile: multiple of 8 sublanes, capped by block_rows.
    # TODO(synk): pick block_rows per TPU generation / scoped-VMEM limit.
    TB = min(block_rows, _round_up(B, 8))
    Bp = _round_up(B, TB)
    if Bp != B:
        x = jnp.pad(x, ((0, Bp - B), (0, 0)))  # mask tail tile via padding

    grid = (Bp // TB,)

    cost = pl.CostEstimate(
        flops=2 * Bp * in_dim * out_dim,
        transcendentals=0,
        bytes_accessed=4 * (Bp * in_dim + in_dim * out_dim + out_dim
                            + Bp * out_dim),
    )

    q_padded = pl.pallas_call(
        _critic_head_kernel,
        out_shape=jax.ShapeDtypeStruct((Bp, out_dim), jnp.float32),
        grid=grid,
        in_specs=[
            # Observations: tiled along batch.
            pl.BlockSpec((TB, in_dim), lambda i: (i, 0)),
            # Weight + bias: resident across all grid steps.
            pl.BlockSpec((in_dim, out_dim), lambda i: (0, 0)),
            pl.BlockSpec((1, out_dim), lambda i: (0, 0)),
        ],
        out_specs=pl.BlockSpec((TB, out_dim), lambda i: (i, 0)),
        compiler_params=pltpu.CompilerParams(
            dimension_semantics=("parallel",),
        ),
        cost_estimate=cost,
    )(x, wT, b2)

    return q_padded[:B] if Bp != B else q_padded


def _orthogonal(key, out_features, in_features, dtype=jnp.float32):
    """Deterministic equivalent of nn.init.orthogonal_ (gain=1)."""
    rows, cols = out_features, in_features
    flat = jax.random.normal(key, (max(rows, cols), min(rows, cols)),
                             dtype=jnp.float32)
    q, r = jnp.linalg.qr(flat)
    q = q * jnp.sign(jnp.diag(r))          # make decomposition unique
    if rows < cols:
        q = q.T
    return q[:rows, :cols].astype(dtype)


def make_critic_head_params(key, input_size, output_size):
    """Create CriticHead params already in kernel-friendly layout.

    Weight is orthogonal-initialized (PyTorch convention (out, in)), then
    stored transposed (in, out) ONCE here; bias is zeros, stored as (1, out).
    """
    w = _orthogonal(key, output_size, input_size)          # (out, in)
    wT = jnp.asarray(w.T)                                  # (in, out), stored
    b2 = jnp.zeros((1, output_size), dtype=jnp.float32)    # zero bias row
    return w, wT, b2


if __name__ == "__main__":
    key = jax.random.PRNGKey(0)
    k_x, k_w = jax.random.split(key, 2)

    # Small shapes consistent with CriticHead(input_size, output_size).
    # B=13 deliberately ragged; block_rows=8 forces a multi-step batch grid.
    B, INPUT_SIZE, OUTPUT_SIZE = 13, 32, 4

    x = jax.random.normal(k_x, (B, INPUT_SIZE), dtype=jnp.float32)
    w, wT, b2 = make_critic_head_params(k_w, INPUT_SIZE, OUTPUT_SIZE)

    q = critic_head_forward(x, wT, b2, block_rows=8)
    jax.block_until_ready(q)

    # Pure-JAX reference (PyTorch-convention weight).
    q_ref = x @ w.T + b2[0]
    assert q.shape == (B, OUTPUT_SIZE)
    assert jnp.allclose(q, q_ref, atol=1e-5, rtol=1e-5)

    print("KERNEL_OK")
</pallas_src>

<mosaic_0001>
module attributes {stable_mosaic.version = 11 : i64} {
  func.func @_critic_head_kernel(%arg0: i32, %arg1: memref<8x32xf32, #tpu.memory_space<vmem>>, %arg2: memref<32x4xf32, #tpu.memory_space<vmem>>, %arg3: memref<1x4xf32, #tpu.memory_space<vmem>>, %arg4: memref<8x4xf32, #tpu.memory_space<vmem>>) attributes {dimension_semantics = [#tpu.dimension_semantics<parallel>], iteration_bounds = array<i64: 2>, scalar_prefetch = 0 : i64, scratch_operands = 0 : i64, tpu.core_type = #tpu.core_type<tc>, window_params = [{transform_indices = @transform_0, window_bounds = array<i64: 8, 32>}, {pipeline_mode = #tpu.pipeline_mode<synchronous>, transform_indices = @transform_1, window_bounds = array<i64: 32, 4>}, {pipeline_mode = #tpu.pipeline_mode<synchronous>, transform_indices = @transform_2, window_bounds = array<i64: 1, 4>}, {transform_indices = @transform_3, window_bounds = array<i64: 8, 4>}]} {
    %c0 = arith.constant 0 : index
    %c0_0 = arith.constant 0 : index
    %0 = vector.load %arg1[%c0, %c0_0] : memref<8x32xf32, #tpu.memory_space<vmem>>, vector<8x32xf32>
    %c0_1 = arith.constant 0 : index
    %c0_2 = arith.constant 0 : index
    %1 = vector.load %arg2[%c0_1, %c0_2] : memref<32x4xf32, #tpu.memory_space<vmem>>, vector<32x4xf32>
    %cst = arith.constant dense<0.000000e+00> : vector<8x4xf32>
    %2 = tpu.matmul %0, %1, %cst {dimension_numbers = #tpu.dot_dimension_numbers<[1], [0], [0], [1], [0, 0, 1, 1], [], []>} : vector<8x32xf32>, vector<32x4xf32>, vector<8x4xf32> -> vector<8x4xf32>
    %c0_3 = arith.constant 0 : index
    %c0_4 = arith.constant 0 : index
    %3 = vector.load %arg3[%c0_3, %c0_4] : memref<1x4xf32, #tpu.memory_space<vmem>>, vector<1x4xf32>
    %4 = vector.broadcast %3 : vector<1x4xf32> to vector<8x4xf32>
    %5 = arith.addf %2, %4 : vector<8x4xf32>
    %c0_5 = arith.constant 0 : index
    %c0_6 = arith.constant 0 : index
    %6 = vector.load %arg4[%c0_5, %c0_6] : memref<8x4xf32, #tpu.memory_space<vmem>>, vector<8x4xf32>
    tpu.vector_store %arg4[%c0_5, %c0_6], %5 {strides = array<i32>} : memref<8x4xf32, #tpu.memory_space<vmem>>, vector<8x4xf32>,
    return
  }
  func.func @transform_0(%arg0: i32) -> (i32, i32) {
    %c0_i32 = arith.constant 0 : i32
    %c0_i32_0 = arith.constant 0 : i32
    return %arg0, %c0_i32 : i32, i32
  }
  func.func @transform_1(%arg0: i32) -> (i32, i32) {
    %c0_i32 = arith.constant 0 : i32
    %c0_i32_0 = arith.constant 0 : i32
    %c0_i32_1 = arith.constant 0 : i32
    return %c0_i32, %c0_i32_0 : i32, i32
  }
  func.func @transform_2(%arg0: i32) -> (i32, i32) {
    %c0_i32 = arith.constant 0 : i32
    %c0_i32_0 = arith.constant 0 : i32
    %c0_i32_1 = arith.constant 0 : i32
    return %c0_i32, %c0_i32_0 : i32, i32
  }
  func.func @transform_3(%arg0: i32) -> (i32, i32) {
    %c0_i32 = arith.constant 0 : i32
    %c0_i32_0 = arith.constant 0 : i32
    return %arg0, %c0_i32 : i32, i32
  }
}

</mosaic_0001>

<bundles_post_ra>
// kernel: tpu_custom_call.1
= control target key start
LH: loop header
LB: loop body
LE: loop exit
PB: predicated region body
PF: predicated region fallthrough
CT: control target
= control target key end

     0   :  { %s382_s12 = smov 0   ;;  %s414_s0 = inlined_call_operand.vmem [shape: f32[16,32], index: 0, kind: input, shape index: {}]   ;;  %s415_s1 = inlined_call_operand.vmem [shape: f32[32,4], index: 1, kind: input, shape index: {}]   ;;  %s416_s2 = inlined_call_operand.vmem [shape: f32[1,4], index: 2, kind: input, shape index: {}]   ;;  %s417_s3 = inlined_call_operand.vmem [shape: f32[16,4], index: 3, kind: output, shape index: {}]  }
   0x1 LB: > { %s307_s13 = sadd.s32 4294967295, %s357_s12   ;;  %p311_p0 = scmp.ge.s32.totalorder %s357_s12, 1  ;;  %s357_s12 = sphi %s382_s12, %s13_s12  }
   0x2   : > { %p136_p1 = scmp.lt.s32.totalorder %s357_s12, 3 }
   0x4   : > { %p137_p2 = pnand %p311_p0, %p136_p1 }
   0x5   : > { %v167_v0 = vld [vmem:[%s415_s1] sm:$0xff] (!%p137_p2)  ;;  %v168_v1 = vld [vmem:[%s415_s1 + $0x8] sm:$0xff] (!%p137_p2)  ;;  %v169_v2 = vld [vmem:[%s415_s1 + $0x10] sm:$0xff] (!%p137_p2)  ;;  %v359_v3 = vmov (!%p137_p2), 0.0|0.0   ;;  %vm360_vm0 = vmmov (!%p137_p2), 0   ;;  %v361_v6 = vmov (!%p137_p2), 0.0  }
   0x6   : > { %140 = sbr.rel (%p137_p2) target bundleno = 232 (0xe8), region = 32  ;;  %334 = vmatprep.subr.bf16.mxu0 (!%p137_p2), %v359_v3  ;;  %v335_v4 = vpack.c.bf16 (!%p137_p2), %v168_v1, %v167_v0  ;;  %v170_v5 = vld [vmem:[%s415_s1 + $0x18] sm:$0xff] (!%p137_p2)  ;;  %331 = vmatprep.mubr.msk.f32.mxu0 (!%p137_p2), %vm360_vm0, %v361_v6  ;;  %p158_p3 = scmp.lt.s32.totalorder (!%p137_p2), %s307_s13, 1  ;;  %vm178_vm1 = vcmask (!%p137_p2), 261120   ;;  %v314_v9 = vld [vmem:[%s416_s2] ss:$0 sm:$0xff] (!%p137_p2) }
   0x7   : > { %v338_v7 = vpack.c.bf16 (!%p137_p2), %v170_v5, %v169_v2  ;;  %vm252_vm2 = vcmask (!%p137_p2), 31744  }
   0x8   : > { %336 = vmatpush3.bf16.msra.mxu0 (!%p137_p2), %v335_v4 }
   0x9   : > { %337 = vmatprep.subr.bf16.mxu0 (!%p137_p2), %v359_v3 }
   0xc   : > { %339 = vmatpush3.bf16.msra.mxu0 (!%p137_p2), %v338_v7 }
   0xd   : > { %s419_s13 = smov (!%p158_p3, %s307_s13), 1 }
   0xe   : > { %s312_s22 = sshll.u32 %s419_s13, 3 }
   0xf   : > { %s161_s25 = scalar_lea.vmem %s414_s0, %s312_s22  ;;  %s165_s30 = scalar_lea.vmem %s417_s3, %s312_s22 }
  0x10   : > { %v166_v8 = vld [vmem:[%s161_s25] sm:$0xff] }
  0x11   : > { %332 = vmatmul.mubr.msk.f32.vlgmr.msra.gmra.mrb[0].mxu0 %vm178_vm1, %v166_v8 }
  0xe4   : > { %v248_v10 = vpop.f32.mrb[0].mxu0 }
  0xe5   : > { %v249_v11 = vadd.f32 %v314_v9, %v248_v10  ;;  %v333_v12 = vpop.f32.mrb[1].mxu0 }
  0xe7   : > { %253 = vst.msk [vmem:[%s165_s30] sm:$0xff] %vm252_vm2, %v249_v11 }
  0xe8 PF: > { %s13_s12 = sadd.s32 1, %s357_s12  }
  0xe9   : > { %p10_p4 = scmp.ge.s32.totalorder %s13_s12, 4  }
  0xeb   :  { %12 = sbr.rel (!%p10_p4) target bundleno = 1 (0x1), region = 62 }

</bundles_post_ra>
